<compile_context>
chip_gen: v6e
topology: v6e:2x2x1
jax: 0.10.0
libtpu: 0.0.40
codegen_flags: <defaults>
</compile_context>

<pallas_src>
import jax
import jax.numpy as jnp
from jax.experimental import pallas as pl
from jax.experimental.pallas import tpu as pltpu

HALF = 500          # torch.split(x, 500, dim=1)
CHUNK = 50          # torch.split(half, 50, dim=1) -- elementwise + cat => no-op chunking
WIDTH = 2 * HALF    # columns actually consumed by the module


def _sigmoid(x):
    # tanh-based sigmoid: single EUP push (tanh) + two cheap VPU ops.
    # Avoids exp(-x) overflow to inf and halves the EUP pressure vs the
    # 1/(1+exp(-x)) form.  Downstream sub/div forces the output to NaN, so
    # ULP-level differences vs torch.sigmoid are irrelevant.
    return 0.5 * jnp.tanh(0.5 * x) + 0.5


def pointwise_kernel(x_ref, o_ref):
    # x_ref: (row_block, 1000) -- full row block, one lane-dense DMA per step.
    x = x_ref[...]

    # sigmoid + relu apply to BOTH halves, so do them on the full 1000-wide
    # block (exactly the work the torch graph does, no waste, no early split).
    y = jnp.maximum(_sigmoid(x), 0.0)

    # Pair column j with column 500 + j.  The second slice is a lane-offset
    # relayout in-register (XLU rotates); for this memory-bound kernel it is
    # hidden under the block DMA / EUP time.
    r1 = y[:, :HALF]
    r2 = y[:, HALF:WIDTH]

    # Literal add/mul/sub/div chain to preserve IEEE semantics of the module:
    # sub == 0 everywhere, so div == 0/0 == NaN, matching torch.
    add = r1 + r2
    mul = add * add
    sub = mul - mul
    div = sub / sub

    o_ref[...] = div.astype(o_ref.dtype)


def _pick_row_block(B):
    # Small batches: one block.  Large batches: 2-4 MB blocks (>=85% of HBM
    # roofline), at least two grid steps so v7x's two TensorCores both work,
    # capped at 1024 rows so the double-buffered footprint
    # (2 * (4 MB in + 2 MB out) = 12 MB) fits every generation's scoped VMEM.
    if B <= 512:
        return B
    rb = min(1024, -(-B // 2))      # >= 2 grid steps
    return -(-rb // 8) * 8          # keep sublane (8) alignment


def pointwise_forward(x, *, row_block=None):
    B, W = x.shape
    assert W >= WIDTH, "module needs at least two 500-wide column chunks"
    if W > WIDTH:
        # torch module only consumes inputs[0] and inputs[1]; extra columns are
        # ignored (this slice only materializes in the non-canonical W>1000 case).
        x = x[:, :WIDTH]

    if row_block is None:
        row_block = _pick_row_block(B)

    grid = (pl.cdiv(B, row_block),)

    return pl.pallas_call(
        pointwise_kernel,
        grid=grid,
        in_specs=[pl.BlockSpec((row_block, WIDTH), lambda i: (i, 0))],
        out_specs=pl.BlockSpec((row_block, HALF), lambda i: (i, 0)),
        out_shape=jax.ShapeDtypeStruct((B, HALF), x.dtype),
        compiler_params=pltpu.CompilerParams(
            dimension_semantics=("parallel",)),  # batch axis; shards across TCs on v7x
    )(x)


def reference_forward(x):
    # Pure-JAX reference mirroring the PyTorch forward chunk-by-chunk.
    inputs = [x[:, k * HALF:(k + 1) * HALF] for k in range(x.shape[1] // HALF)]
    n_c = inputs[0].shape[1] // CHUNK
    x_split = [inputs[0][:, i * CHUNK:(i + 1) * CHUNK] for i in range(n_c)]
    y_split = [inputs[1][:, i * CHUNK:(i + 1) * CHUNK] for i in range(n_c)]
    sig1 = [_sigmoid(c) for c in x_split]
    sig2 = [_sigmoid(c) for c in y_split]
    relu1 = [jnp.maximum(c, 0.0) for c in sig1]
    relu2 = [jnp.maximum(c, 0.0) for c in sig2]
    add = [p + q for p, q in zip(relu1, relu2)]
    mul = [c * c for c in add]
    sub = [c - c for c in mul]
    div = [c / c for c in sub]
    return jnp.concatenate(div, axis=1)


if __name__ == "__main__":
    # Small shapes consistent with the module: the hard-coded splits require
    # width 2*500 = 1000; keep the batch small (8).
    B, W = 8, WIDTH

    key = jax.random.PRNGKey(0)
    x = jax.random.normal(key, (B, W), dtype=jnp.float32)

    out = pointwise_forward(x)
    out = jax.block_until_ready(out)

    ref = reference_forward(x)

    assert out.shape == (B, HALF), out.shape
    # Semantically the output is 0/0 = NaN everywhere; verify both that and
    # elementwise agreement with the chunked reference.
    assert bool(jnp.all(jnp.isnan(out))), "expected all-NaN output (sub/sub = 0/0)"
    assert bool(jnp.all(jnp.isclose(out, ref, atol=1e-6, rtol=1e-6, equal_nan=True))), \
        "mismatch vs reference"

    print("KERNEL_OK")
</pallas_src>

<mosaic_0001>
module attributes {stable_mosaic.version = 11 : i64} {
  func.func @pointwise_kernel(%arg0: i32, %arg1: memref<8x1000xf32, #tpu.memory_space<vmem>>, %arg2: memref<8x500xf32, #tpu.memory_space<vmem>>) attributes {dimension_semantics = [#tpu.dimension_semantics<parallel>], iteration_bounds = array<i64: 1>, scalar_prefetch = 0 : i64, scratch_operands = 0 : i64, tpu.core_type = #tpu.core_type<tc>, window_params = [{transform_indices = @transform_0, window_bounds = array<i64: 8, 1000>}, {transform_indices = @transform_1, window_bounds = array<i64: 8, 500>}]} {
    %c0 = arith.constant 0 : index
    %c0_0 = arith.constant 0 : index
    %0 = vector.load %arg1[%c0, %c0_0] : memref<8x1000xf32, #tpu.memory_space<vmem>>, vector<8x1000xf32>
    %cst = arith.constant 5.000000e-01 : f32
    %1 = vector.broadcast %cst : f32 to vector<8x1000xf32>
    %2 = arith.mulf %1, %0 : vector<8x1000xf32>
    %3 = math.tanh %2 : vector<8x1000xf32>
    %cst_1 = arith.constant 5.000000e-01 : f32
    %4 = vector.broadcast %cst_1 : f32 to vector<8x1000xf32>
    %5 = arith.mulf %4, %3 : vector<8x1000xf32>
    %cst_2 = arith.constant 5.000000e-01 : f32
    %6 = vector.broadcast %cst_2 : f32 to vector<8x1000xf32>
    %7 = arith.addf %5, %6 : vector<8x1000xf32>
    %cst_3 = arith.constant 0.000000e+00 : f32
    %8 = vector.broadcast %cst_3 : f32 to vector<8x1000xf32>
    %9 = arith.maximumf %7, %8 : vector<8x1000xf32>
    %10 = vector.extract_strided_slice %9 {offsets = [0, 0], sizes = [8, 500], strides = [1, 1]} : vector<8x1000xf32> to vector<8x500xf32>
    %11 = vector.extract_strided_slice %9 {offsets = [0, 500], sizes = [8, 500], strides = [1, 1]} : vector<8x1000xf32> to vector<8x500xf32>
    %12 = arith.addf %10, %11 : vector<8x500xf32>
    %13 = arith.mulf %12, %12 : vector<8x500xf32>
    %14 = arith.subf %13, %13 : vector<8x500xf32>
    %15 = arith.divf %14, %14 : vector<8x500xf32>
    %c0_4 = arith.constant 0 : index
    %c0_5 = arith.constant 0 : index
    %16 = vector.load %arg2[%c0_4, %c0_5] : memref<8x500xf32, #tpu.memory_space<vmem>>, vector<8x500xf32>
    tpu.vector_store %arg2[%c0_4, %c0_5], %15 {strides = array<i32>} : memref<8x500xf32, #tpu.memory_space<vmem>>, vector<8x500xf32>,
    return
  }
  func.func @transform_0(%arg0: i32) -> (i32, i32) {
    %c0_i32 = arith.constant 0 : i32
    %c0_i32_0 = arith.constant 0 : i32
    return %arg0, %c0_i32 : i32, i32
  }
  func.func @transform_1(%arg0: i32) -> (i32, i32) {
    %c0_i32 = arith.constant 0 : i32
    %c0_i32_0 = arith.constant 0 : i32
    return %arg0, %c0_i32 : i32, i32
  }
}

</mosaic_0001>

<bundles_post_ra>
// kernel: tpu_custom_call.1
= control target key start
LH: loop header
LB: loop body
LE: loop exit
PB: predicated region body
PF: predicated region fallthrough
CT: control target
= control target key end

     0   :  { %6 = vsyncpa [#allocation3], 0  ;;  %s227_s0 = inlined_call_operand.hbm [shape: f32[8,1000], index: 0, kind: input, shape index: {}]   ;;  %s228_s1 = inlined_call_operand.hbm [shape: f32[8,500], index: 1, kind: output, shape index: {}]  }
   0x1   :  { %7 = vsyncpa [#allocation4], 0  ;;  %s204_s6 = smov [#allocation2]  }
   0x2   :  { %s14_s7 = sshll.u32 %s204_s6, 4  ;;  %s15_s7 = int_to_ptr.vmem [resolvable:$true] %s14_s7 }
   0x3   :  { %s168_s8 = scalar_lea.vmem %s15_s7, 1024  ;;  %p173_p1 = scmp.lt.s32.totalorder %s15_s7, %s15_s7 }
   0x4   :  { %p169_p0 = scmp.ne.s32.totalorder %s15_s7, %s168_s8  ;;  %p174_p2 = scmp.lt.s32.totalorder %s168_s8, %s168_s8 }
   0x6   :  { %p175_p3 = por %p174_p2, %p173_p1 }
   0x8   :  { %p176_p4 = pnand %p175_p3, %p169_p0 }
   0xa   :  { %179 = shalt.err (!%p176_p4)
}
   0xb   :  { %17 = dma.hbm_to_vmem [thread:$0]  %s227_s0, 1024, %s15_s7, [#allocation3]  }
   0xc   :  { %200 = dma.done.wait [#allocation3], 1024  }
   0xd   :  { %201 = vsyncadd [#allocation3], 4294966272  ;;  %v26_v0 = vld [vmem:[#allocation2 + $0x28] sm:$0xff]  ;;  %v24_v1 = vld [vmem:[#allocation2 + $0x18] sm:$0xff]  ;;  %s205_s0 = smov 12   ;;  %vm84_vm0 = vcmask 97280  }
   0xe   :  { %v27_v2 = vld [vmem:[#allocation2 + $0x30] sm:$0xff]  ;;  %v34_v3 = vmul.f32 0.5, %v26_v0  ;;  %v32_v4 = vmul.f32 0.5, %v24_v1  ;;  %v25_v6 = vld [vmem:[#allocation2 + $0x20] sm:$0xff]  ;;  %v28_v7 = vld [vmem:[#allocation2 + $0x38] sm:$0xff]  ;;  %s206_s11 = smov [#allocation5]  }
   0xf   :  { %v35_v5 = vmul.f32 0.5, %v27_v2  ;;  %v33_v8 = vmul.f32 0.5, %v25_v6  ;;  %v36_v9 = vmul.f32 0.5, %v28_v7  ;;  %v23_v30 = vld [vmem:[#allocation2 + $0x10] sm:$0xff]  ;;  %v21_v31 = vld [vmem:[#allocation2] sm:$0xff]  ;;  %v22_v32 = vld [vmem:[#allocation2 + $0x8] sm:$0xff] }
  0x10   :  { %136 = vtanh.f32 %v34_v3  ;;  %v31_v33 = vmul.f32 0.5, %v23_v30  ;;  %v29_v34 = vmul.f32 0.5, %v21_v31  ;;  %v30_v35 = vmul.f32 0.5, %v22_v32  ;;  %s124_s12 = sshll.u32 %s206_s11, 4  ;;  %s125_s12 = int_to_ptr.vmem [resolvable:$true] %s124_s12 }
  0x11   :  { %138 = vtanh.f32 %v32_v4  ;;  %vm116_vm1 = vcmask 949248   ;;  %s180_s13 = scalar_lea.vmem %s125_s12, 512  ;;  %p185_p6 = scmp.lt.s32.totalorder %s125_s12, %s125_s12 }
  0x12   :  { %140 = vtanh.f32 %v35_v5  ;;  %p181_p5 = scmp.ne.s32.totalorder %s125_s12, %s180_s13  ;;  %p186_p7 = scmp.lt.s32.totalorder %s180_s13, %s180_s13 }
  0x13   :  { %142 = vtanh.f32 %v33_v8 }
  0x14   :  { %144 = vtanh.f32 %v36_v9  ;;  %p187_p8 = por %p186_p7, %p185_p6 }
  0x15   :  { %146 = vtanh.f32 %v31_v33 }
  0x16   :  { %148 = vtanh.f32 %v29_v34  ;;  %p188_p9 = pnand %p187_p8, %p181_p5 }
  0x17   :  { %150 = vtanh.f32 %v30_v35 }
  0x1d   :  { %v137_v10 = vpop.eup %136 }
  0x1e   :  { %v139_v11 = vpop.eup %138  ;;  %v50_v12 = vmul.f32 0.5, %v137_v10 }
  0x1f   :  { %v141_v13 = vpop.eup %140  ;;  %v48_v14 = vmul.f32 0.5, %v139_v11 }
  0x20   :  { %v143_v15 = vpop.eup %142  ;;  %v58_v16 = vadd.f32 0.5, %v50_v12  ;;  %v51_v17 = vmul.f32 0.5, %v141_v13 }
  0x21   :  { %v145_v18 = vpop.eup %144  ;;  %v56_v19 = vadd.f32 0.5, %v48_v14  ;;  %v49_v20 = vmul.f32 0.5, %v143_v15 }
  0x22   :  { %v66_v21 = vmax.f32 %v58_v16, 0.0  ;;  %v59_v22 = vadd.f32 0.5, %v51_v17  ;;  %v52_v23 = vmul.f32 0.5, %v145_v18  ;;  %v147_v36 = vpop.eup %146 }
  0x23   :  { %v64_v24 = vmax.f32 %v56_v19, 0.0  ;;  %v57_v25 = vadd.f32 0.5, %v49_v20  ;;  %v149_v37 = vpop.eup %148  ;;  %v47_v39 = vmul.f32 0.5, %v147_v36 }
  0x24   :  { %78 = vrot.lane.b32.xlu1 %v66_v21, %s205_s0  ;;  %v67_v26 = vmax.f32 %v59_v22, 0.0  ;;  %v60_v28 = vadd.f32 0.5, %v52_v23  ;;  %v151_v38 = vpop.eup %150  ;;  %v45_v40 = vmul.f32 0.5, %v149_v37 }
  0x25   :  { %74 = vrot.lane.b32.xlu0 %v64_v24, %s205_s0  ;;  %v65_v27 = vmax.f32 %v57_v25, 0.0  ;;  %v46_v41 = vmul.f32 0.5, %v151_v38  ;;  %v55_v42 = vadd.f32 0.5, %v47_v39 }
  0x26   :  { %v68_v29 = vmax.f32 %v60_v28, 0.0  ;;  %v53_v43 = vadd.f32 0.5, %v45_v40 }
  0x27   :  { %v54_v44 = vadd.f32 0.5, %v46_v41  ;;  %v63_v47 = vmax.f32 %v55_v42, 0.0 }
  0x28   :  { %80 = vrot.lane.b32.xlu1 %v67_v26, %s205_s0  ;;  %v61_v48 = vmax.f32 %v53_v43, 0.0 }
  0x29   :  { %76 = vrot.lane.b32.xlu0 %v65_v27, %s205_s0  ;;  %v62_v49 = vmax.f32 %v54_v44, 0.0 }
  0x2d   :  { %82 = vrot.lane.b32.xlu0 %v68_v29, %s205_s0 }
  0x96   :  { %v79_v45 = vpop.permute.xlu1 %78 }
  0x97   :  { %v75_v46 = vpop.permute.xlu0 %74 }
  0x9a   :  { %v81_v50 = vpop.permute.xlu1 %80 }
  0x9b   :  { %v87_v51 = vsel %vm84_vm0, %v79_v45, %v81_v50  ;;  %v77_v52 = vpop.permute.xlu0 %76 }
  0x9c   :  { %v95_v53 = vadd.f32 %v87_v51, %v63_v47  ;;  %v85_v54 = vsel %vm84_vm0, %v75_v46, %v77_v52  ;;  %v86_v55 = vsel %vm84_vm0, %v77_v52, %v79_v45 }
  0x9d   :  { %v93_v56 = vadd.f32 %v85_v54, %v61_v48  ;;  %v94_v57 = vadd.f32 %v86_v55, %v62_v49 }
  0x9e   :  { %v99_v58 = vmul.f32 %v95_v53, %v95_v53 }
  0x9f   :  { %v97_v59 = vmul.f32 %v93_v56, %v93_v56  ;;  %v98_v60 = vmul.f32 %v94_v57, %v94_v57  ;;  %v83_v61 = vpop.permute.xlu0 %82 }
  0xa0   :  { %v103_v62 = vsub.f32 %v99_v58, %v99_v58  ;;  %v88_v63 = vsel %vm84_vm0, %v81_v50, %v83_v61 }
  0xa1   :  { %v101_v0 = vsub.f32 %v97_v59, %v97_v59  ;;  %v102_v1 = vsub.f32 %v98_v60, %v98_v60  ;;  %v96_v2 = vadd.f32 %v88_v63, %v64_v24 }
  0xa2   :  { %152 = vrcp.f32 %v103_v62 }
  0xa3   :  { %154 = vrcp.f32 %v101_v0  ;;  %v100_v3 = vmul.f32 %v96_v2, %v96_v2 }
  0xa4   :  { %156 = vrcp.f32 %v102_v1 }
  0xa5   :  { %v104_v4 = vsub.f32 %v100_v3, %v100_v3 }
  0xa7   :  { %158 = vrcp.f32 %v104_v4 }
  0xaf   :  { %v153_v5 = vpop.eup %152 }
  0xb0   :  { %v155_v6 = vpop.eup %154  ;;  %v110_v7 = vmul.f32 %v153_v5, %v103_v62 }
  0xb1   :  { %v157_v8 = vpop.eup %156  ;;  %v106_v9 = vmul.f32 %v155_v6, %v101_v0 }
  0xb2   :  { %115 = vst [vmem:[#allocation5 + $0x10] sm:$0xff] %v110_v7  ;;  %v108_v10 = vmul.f32 %v157_v8, %v102_v1 }
  0xb3   :  { %113 = vst [vmem:[#allocation5] sm:$0xff] %v106_v9 }
  0xb4   :  { %v159_v11 = vpop.eup %158  ;;  %114 = vst [vmem:[#allocation5 + $0x8] sm:$0xff] %v108_v10 }
  0xb5   :  { %v112_v12 = vmul.f32 %v159_v11, %v104_v4 }
  0xb7   :  { %117 = vst.msk [vmem:[#allocation5 + $0x18] sm:$0xff] %vm116_vm1, %v112_v12 }
  0xb8   :  { %191 = shalt.err (!%p188_p9)
}
  0xb9   :  { %127 = dma.vmem_to_hbm [thread:$0]  %s125_s12, 512, %s228_s1, [#allocation4]  }
  0xba   :  { %202 = dma.done.wait [#allocation4], 512  }
  0xbb   :  { %203 = vsyncadd [#allocation4], 4294966784 }
  0xbc   :  { %131 = vsyncpa [#allocation3], 1 }
  0xbd   :  { %132 = vsyncpa [#allocation4], 1 }

</bundles_post_ra>
